<compile_context>
chip_gen: v6e
topology: v6e:2x2x1
jax: 0.10.0
libtpu: 0.0.40
codegen_flags: <defaults>
</compile_context>

<pallas_src>
import functools

import jax
import jax.numpy as jnp
from jax import lax
from jax.experimental import pallas as pl
from jax.experimental.pallas import tpu as pltpu


def _round_up(x, m):
    return (x + m - 1) // m * m


def _pr_embedding_bag_kernel(starts_ref, ends_ref, idx_ref, psw_ref, table_ref,
                             *rest, apply_proj):
    """One bag-tile: pooled = S @ G @ table (then optional projection)."""
    if apply_proj:
        proj_ref, out_ref = rest
    else:
        (out_ref,) = rest

    TB = out_ref.shape[0]
    L_pad = idx_ref.shape[0]
    N_pad = table_ref.shape[0]

    # Bag selection matrix S[b, i] = 1.0 iff lookup i belongs to bag b.
    li = lax.broadcasted_iota(jnp.int32, (TB, L_pad), 1)
    sel = ((li >= starts_ref[...]) & (li < ends_ref[...])).astype(jnp.float32)

    # Weighted one-hot gather matrix G[i, n] = psw[i] * (indices[i] == n).
    # Padded lookups carry psw == 0 (and are outside every bag), so they
    # contribute nothing; out-of-range indices simply select no row.
    ni = lax.broadcasted_iota(jnp.int32, (L_pad, N_pad), 1)
    onehot = (ni == idx_ref[...]).astype(jnp.float32) * psw_ref[...]

    # EmbeddingBag mode='sum' with per_sample_weights, fully on the MXU.
    w = jnp.dot(sel, onehot, preferred_element_type=jnp.float32)           # [TB, N_pad]
    pooled = jnp.dot(w, table_ref[...], preferred_element_type=jnp.float32)  # [TB, D_pad]

    if apply_proj:
        out_ref[...] = jnp.dot(pooled, proj_ref[...],
                               preferred_element_type=jnp.float32)
    else:
        out_ref[...] = pooled  # Identity projection: no wasted MXU work.


def pr_embedding_bag(indices, offsets, emb_table, proj_w=None,
                     per_sample_weights=None, *, bag_tile=128):
    """Forward pass of PrEmbeddingBag.

    indices: [L] int, offsets: [B] int (bag starts, offsets[0] == 0),
    emb_table: [N, D] f32,
    proj_w: optional [D, Dout] f32 (pre-transposed nn.Linear weight); None => Identity,
    per_sample_weights: optional [L] f32.
    Returns [B, Dout] f32 (Dout == D when proj_w is None).
    """
    L = int(indices.shape[0])
    B = int(offsets.shape[0])
    N, D = int(emb_table.shape[0]), int(emb_table.shape[1])
    apply_proj = proj_w is not None
    Dout = int(proj_w.shape[1]) if apply_proj else D

    if per_sample_weights is None:
        per_sample_weights = jnp.ones((L,), jnp.float32)

    # Lane/sublane-dense padded shapes.
    L_pad = _round_up(max(L, 1), 128)
    N_pad = _round_up(N, 128)
    D_pad = _round_up(D, 128)
    Dout_pad = _round_up(Dout, 128)
    TB = min(bag_tile, _round_up(B, 8))       # bag tile (sublane multiple)
    B_pad = _round_up(B, TB)
    n_tiles = B_pad // TB

    # Indices / weights as VMEM column vectors (no SMEM scalar loads in the
    # hot path); pad lookups with index 0 / weight 0.
    idx = jnp.pad(indices.astype(jnp.int32), (0, L_pad - L)).reshape(L_pad, 1)
    psw = jnp.pad(per_sample_weights.astype(jnp.float32),
                  (0, L_pad - L)).reshape(L_pad, 1)

    # Bag [start, end) ranges; padded bags are empty (start == end == L) and
    # therefore pool to zeros, matching torch's empty-bag semantics.
    offs = offsets.astype(jnp.int32)
    starts = jnp.pad(offs, (0, B_pad - B), constant_values=L).reshape(B_pad, 1)
    ends = jnp.pad(jnp.concatenate([offs[1:], jnp.array([L], jnp.int32)]),
                   (0, B_pad - B), constant_values=L).reshape(B_pad, 1)

    table = jnp.pad(emb_table.astype(jnp.float32),
                    ((0, N_pad - N), (0, D_pad - D)))

    args = [starts, ends, idx, psw, table]
    in_specs = [
        pl.BlockSpec((TB, 1), lambda i: (i, 0)),          # bag starts (per tile)
        pl.BlockSpec((TB, 1), lambda i: (i, 0)),          # bag ends   (per tile)
        pl.BlockSpec((L_pad, 1), lambda i: (0, 0)),       # indices
        pl.BlockSpec((L_pad, 1), lambda i: (0, 0)),       # per-sample weights
        pl.BlockSpec((N_pad, D_pad), lambda i: (0, 0)),   # embedding table
    ]
    if apply_proj:
        proj = jnp.pad(proj_w.astype(jnp.float32),
                       ((0, D_pad - D), (0, Dout_pad - Dout)))
        args.append(proj)
        in_specs.append(pl.BlockSpec((D_pad, Dout_pad), lambda i: (0, 0)))

    # Advisory cost + explicit VMEM budget (portable across 16/32 MiB default
    # scoped limits on v5e / v6e / v7x).
    flops = 2 * n_tiles * (TB * L_pad * N_pad + TB * N_pad * D_pad
                           + (TB * D_pad * Dout_pad if apply_proj else 0))
    bytes_accessed = 4 * (2 * B_pad + 2 * L_pad + N_pad * D_pad
                          + (D_pad * Dout_pad if apply_proj else 0)
                          + B_pad * Dout_pad)
    vmem_bytes = 4 * (2 * TB + 2 * L_pad + N_pad * D_pad
                      + (D_pad * Dout_pad if apply_proj else 0)
                      + TB * Dout_pad
                      + TB * L_pad + L_pad * N_pad + TB * N_pad + TB * D_pad)
    vmem_limit = int(min(max(4 * vmem_bytes, 16 * 1024 * 1024),
                         100 * 1024 * 1024))

    out_pad = pl.pallas_call(
        functools.partial(_pr_embedding_bag_kernel, apply_proj=apply_proj),
        out_shape=jax.ShapeDtypeStruct((B_pad, Dout_pad), jnp.float32),
        grid_spec=pltpu.PrefetchScalarGridSpec(
            num_scalar_prefetch=0,
            grid=(n_tiles,),
            in_specs=in_specs,
            out_specs=pl.BlockSpec((TB, Dout_pad), lambda i: (i, 0)),
        ),
        compiler_params=pltpu.CompilerParams(
            dimension_semantics=("parallel",),
            vmem_limit_bytes=vmem_limit),
        cost_estimate=pl.CostEstimate(flops=flops, transcendentals=0,
                                      bytes_accessed=bytes_accessed),
    )(*args)

    return out_pad[:B, :Dout]


def make_pr_embedding_bag_params(key, num_embeddings, embedding_dim, base_dim):
    """Deterministic parameter init mirroring PrEmbeddingBag.__init__ (init=False)."""
    assert embedding_dim <= base_dim
    k_emb, k_proj = jax.random.split(key)
    # xavier_uniform_ on embs.weight [N, D]
    a_emb = (6.0 / (num_embeddings + embedding_dim)) ** 0.5
    emb_table = jax.random.uniform(k_emb, (num_embeddings, embedding_dim),
                                   jnp.float32, -a_emb, a_emb)
    if embedding_dim < base_dim:
        # xavier_uniform_ on proj.weight [base_dim, D]; stored transposed [D, base_dim].
        a_proj = (6.0 / (base_dim + embedding_dim)) ** 0.5
        proj_weight = jax.random.uniform(k_proj, (base_dim, embedding_dim),
                                         jnp.float32, -a_proj, a_proj)
        proj_w = proj_weight.T
    else:
        proj_w = None   # nn.Identity(): kernel skips the projection matmul.
    return emb_table, proj_w


def _reference(indices, offsets, emb_table, proj_w, per_sample_weights):
    """Pure-JAX reference for correctness check."""
    L = indices.shape[0]
    B = offsets.shape[0]
    off_ext = jnp.concatenate([offsets, jnp.array([L], dtype=offsets.dtype)])
    seg_ids = jnp.sum(jnp.arange(L)[:, None] >= off_ext[None, 1:], axis=1)
    rows = emb_table[indices] * per_sample_weights[:, None]
    pooled = jax.ops.segment_sum(rows, seg_ids, num_segments=B)
    return pooled @ proj_w if proj_w is not None else pooled


if __name__ == "__main__":
    key = jax.random.PRNGKey(0)
    k_idx, k_psw, k_param = jax.random.split(key, 3)

    num_embeddings = 32
    embedding_dim = 16
    base_dim = 32          # embedding_dim < base_dim -> projection path
    L = 10                 # total number of lookups
    B = 4                  # number of bags

    indices = jax.random.randint(k_idx, (L,), 0, num_embeddings, dtype=jnp.int32)
    offsets = jnp.array([0, 3, 3, 7], dtype=jnp.int32)   # includes an empty bag
    per_sample_weights = jax.random.uniform(k_psw, (L,), jnp.float32, 0.5, 1.5)

    # --- Projection path (embedding_dim < base_dim) -------------------------
    emb_table, proj_w = make_pr_embedding_bag_params(
        k_param, num_embeddings, embedding_dim, base_dim)

    out = pr_embedding_bag(indices, offsets, emb_table, proj_w,
                           per_sample_weights=per_sample_weights)
    out = jax.block_until_ready(out)
    ref = _reference(indices, offsets, emb_table, proj_w, per_sample_weights)
    assert out.shape == (B, base_dim)
    assert jnp.allclose(out, ref, atol=1e-5, rtol=1e-5), "proj path mismatch"

    # --- Identity path (embedding_dim == base_dim) --------------------------
    emb_table_id, proj_none = make_pr_embedding_bag_params(
        k_param, num_embeddings, base_dim, base_dim)
    out_id = pr_embedding_bag(indices, offsets, emb_table_id, proj_none,
                              per_sample_weights=per_sample_weights)
    out_id = jax.block_until_ready(out_id)
    ref_id = _reference(indices, offsets, emb_table_id, None, per_sample_weights)
    assert out_id.shape == (B, base_dim)
    assert jnp.allclose(out_id, ref_id, atol=1e-5, rtol=1e-5), "identity path mismatch"

    print("KERNEL_OK")
</pallas_src>

<mosaic_0001>
module attributes {stable_mosaic.version = 11 : i64} {
  func.func @_pr_embedding_bag_kernel(%arg0: i32, %arg1: memref<8x1xi32, #tpu.memory_space<vmem>>, %arg2: memref<8x1xi32, #tpu.memory_space<vmem>>, %arg3: memref<128x1xi32, #tpu.memory_space<vmem>>, %arg4: memref<128x1xf32, #tpu.memory_space<vmem>>, %arg5: memref<128x128xf32, #tpu.memory_space<vmem>>, %arg6: memref<128x128xf32, #tpu.memory_space<vmem>>, %arg7: memref<8x128xf32, #tpu.memory_space<vmem>>) attributes {dimension_semantics = [#tpu.dimension_semantics<parallel>], iteration_bounds = array<i64: 1>, scalar_prefetch = 0 : i64, scratch_operands = 0 : i64, tpu.core_type = #tpu.core_type<tc>, window_params = [{transform_indices = @transform_0, window_bounds = array<i64: 8, 1>}, {transform_indices = @transform_1, window_bounds = array<i64: 8, 1>}, {pipeline_mode = #tpu.pipeline_mode<synchronous>, transform_indices = @transform_2, window_bounds = array<i64: 128, 1>}, {pipeline_mode = #tpu.pipeline_mode<synchronous>, transform_indices = @transform_3, window_bounds = array<i64: 128, 1>}, {pipeline_mode = #tpu.pipeline_mode<synchronous>, transform_indices = @transform_4, window_bounds = array<i64: 128, 128>}, {pipeline_mode = #tpu.pipeline_mode<synchronous>, transform_indices = @transform_5, window_bounds = array<i64: 128, 128>}, {transform_indices = @transform_6, window_bounds = array<i64: 8, 128>}]} {
    %0 = tpu.iota {dimensions = array<i32: 1>} : vector<8x128xi32>
    %c0 = arith.constant 0 : index
    %c0_0 = arith.constant 0 : index
    %1 = vector.load %arg1[%c0, %c0_0] : memref<8x1xi32, #tpu.memory_space<vmem>>, vector<8x1xi32>
    %2 = vector.broadcast %1 : vector<8x1xi32> to vector<8x128xi32>
    %3 = arith.cmpi sge, %0, %2 : vector<8x128xi32>
    %c0_1 = arith.constant 0 : index
    %c0_2 = arith.constant 0 : index
    %4 = vector.load %arg2[%c0_1, %c0_2] : memref<8x1xi32, #tpu.memory_space<vmem>>, vector<8x1xi32>
    %5 = vector.broadcast %4 : vector<8x1xi32> to vector<8x128xi32>
    %6 = arith.cmpi slt, %0, %5 : vector<8x128xi32>
    %7 = arith.andi %3, %6 : vector<8x128xi1>
    %8 = arith.extui %7 : vector<8x128xi1> to vector<8x128xi32>
    %9 = arith.sitofp %8 : vector<8x128xi32> to vector<8x128xf32>
    %10 = tpu.iota {dimensions = array<i32: 1>} : vector<128x128xi32>
    %c0_3 = arith.constant 0 : index
    %c0_4 = arith.constant 0 : index
    %11 = vector.load %arg3[%c0_3, %c0_4] : memref<128x1xi32, #tpu.memory_space<vmem>>, vector<128x1xi32>
    %12 = vector.broadcast %11 : vector<128x1xi32> to vector<128x128xi32>
    %13 = arith.cmpi eq, %10, %12 : vector<128x128xi32>
    %14 = arith.extui %13 : vector<128x128xi1> to vector<128x128xi32>
    %15 = arith.sitofp %14 : vector<128x128xi32> to vector<128x128xf32>
    %c0_5 = arith.constant 0 : index
    %c0_6 = arith.constant 0 : index
    %16 = vector.load %arg4[%c0_5, %c0_6] : memref<128x1xf32, #tpu.memory_space<vmem>>, vector<128x1xf32>
    %17 = vector.broadcast %16 : vector<128x1xf32> to vector<128x128xf32>
    %18 = arith.mulf %15, %17 : vector<128x128xf32>
    %cst = arith.constant dense<0.000000e+00> : vector<8x128xf32>
    %19 = tpu.matmul %9, %18, %cst {dimension_numbers = #tpu.dot_dimension_numbers<[1], [0], [0], [1], [0, 0, 1, 1], [], []>} : vector<8x128xf32>, vector<128x128xf32>, vector<8x128xf32> -> vector<8x128xf32>
    %c0_7 = arith.constant 0 : index
    %c0_8 = arith.constant 0 : index
    %20 = vector.load %arg5[%c0_7, %c0_8] : memref<128x128xf32, #tpu.memory_space<vmem>>, vector<128x128xf32>
    %cst_9 = arith.constant dense<0.000000e+00> : vector<8x128xf32>
    %21 = tpu.matmul %19, %20, %cst_9 {dimension_numbers = #tpu.dot_dimension_numbers<[1], [0], [0], [1], [0, 0, 1, 1], [], []>} : vector<8x128xf32>, vector<128x128xf32>, vector<8x128xf32> -> vector<8x128xf32>
    %c0_10 = arith.constant 0 : index
    %c0_11 = arith.constant 0 : index
    %22 = vector.load %arg6[%c0_10, %c0_11] : memref<128x128xf32, #tpu.memory_space<vmem>>, vector<128x128xf32>
    %cst_12 = arith.constant dense<0.000000e+00> : vector<8x128xf32>
    %23 = tpu.matmul %21, %22, %cst_12 {dimension_numbers = #tpu.dot_dimension_numbers<[1], [0], [0], [1], [0, 0, 1, 1], [], []>} : vector<8x128xf32>, vector<128x128xf32>, vector<8x128xf32> -> vector<8x128xf32>
    %c0_13 = arith.constant 0 : index
    %c0_14 = arith.constant 0 : index
    %24 = vector.load %arg7[%c0_13, %c0_14] : memref<8x128xf32, #tpu.memory_space<vmem>>, vector<8x128xf32>
    tpu.vector_store %arg7[%c0_13, %c0_14], %23 {strides = array<i32>} : memref<8x128xf32, #tpu.memory_space<vmem>>, vector<8x128xf32>,
    return
  }
  func.func @transform_0(%arg0: i32) -> (i32, i32) {
    %c0_i32 = arith.constant 0 : i32
    %c0_i32_0 = arith.constant 0 : i32
    return %arg0, %c0_i32 : i32, i32
  }
  func.func @transform_1(%arg0: i32) -> (i32, i32) {
    %c0_i32 = arith.constant 0 : i32
    %c0_i32_0 = arith.constant 0 : i32
    return %arg0, %c0_i32 : i32, i32
  }
  func.func @transform_2(%arg0: i32) -> (i32, i32) {
    %c0_i32 = arith.constant 0 : i32
    %c0_i32_0 = arith.constant 0 : i32
    %c0_i32_1 = arith.constant 0 : i32
    return %c0_i32, %c0_i32_0 : i32, i32
  }
  func.func @transform_3(%arg0: i32) -> (i32, i32) {
    %c0_i32 = arith.constant 0 : i32
    %c0_i32_0 = arith.constant 0 : i32
    %c0_i32_1 = arith.constant 0 : i32
    return %c0_i32, %c0_i32_0 : i32, i32
  }
  func.func @transform_4(%arg0: i32) -> (i32, i32) {
    %c0_i32 = arith.constant 0 : i32
    %c0_i32_0 = arith.constant 0 : i32
    %c0_i32_1 = arith.constant 0 : i32
    return %c0_i32, %c0_i32_0 : i32, i32
  }
  func.func @transform_5(%arg0: i32) -> (i32, i32) {
    %c0_i32 = arith.constant 0 : i32
    %c0_i32_0 = arith.constant 0 : i32
    %c0_i32_1 = arith.constant 0 : i32
    return %c0_i32, %c0_i32_0 : i32, i32
  }
  func.func @transform_6(%arg0: i32) -> (i32, i32) {
    %c0_i32 = arith.constant 0 : i32
    %c0_i32_0 = arith.constant 0 : i32
    return %arg0, %c0_i32 : i32, i32
  }
}

</mosaic_0001>

<bundles_post_ra>
// kernel: tpu_custom_call.1
= control target key start
LH: loop header
LB: loop body
LE: loop exit
PB: predicated region body
PF: predicated region fallthrough
CT: control target
= control target key end

     0   :  { %v723_v2 = vmov 0   ;;  %v724_v5 = vmov 0.0   ;;  %s1054_s0 = inlined_call_operand.vmem [shape: s32[8,1], index: 0, kind: input, shape index: {}]   ;;  %s1055_s1 = inlined_call_operand.vmem [shape: s32[8,1], index: 1, kind: input, shape index: {}]   ;;  %s1056_s2 = inlined_call_operand.vmem [shape: s32[128,1], index: 2, kind: input, shape index: {}]   ;;  %s1057_s3 = inlined_call_operand.vmem [shape: f32[128,1], index: 3, kind: input, shape index: {}]   ;;  %s1058_s4 = inlined_call_operand.vmem [shape: f32[128,128], index: 4, kind: input, shape index: {}]   ;;  %s1059_s5 = inlined_call_operand.vmem [shape: f32[128,128], index: 5, kind: input, shape index: {}]   ;;  %s1060_s6 = inlined_call_operand.hbm [shape: f32[8,128], index: 6, kind: output, shape index: {}]  }
   0x1   :  { %v166_v0 = vld [vmem:[%s1057_s3 + $0x78] sm:$0xff]  ;;  %700 = vset.pattern.permute.xlu1 %v723_v2  ;;  %699 = vset.pattern.permute.xlu0 %v723_v2  ;;  %v52_v3 = vld [vmem:[%s1056_s2 + $0x68] sm:$0xff]  ;;  %v53_v4 = vld [vmem:[%s1056_s2 + $0x70] sm:$0xff] }
   0x2   :  { %v54_v1 = vld [vmem:[%s1056_s2 + $0x78] sm:$0xff]  ;;  %244 = vperm.xlu1 %700, %v166_v0   ;;  %589 = vmatprep.subr.mxu0 %v724_v5  ;;  %v51_v6 = vld [vmem:[%s1056_s2 + $0x60] sm:$0xff]  ;;  %v165_v7 = vld [vmem:[%s1057_s3 + $0x70] sm:$0xff] }
   0x3   :  { %101 = vperm.xlu0 %699, %v54_v1   ;;  %624 = vmatprep.subr.mxu1 %v724_v5  ;;  %v50_v8 = vld [vmem:[%s1056_s2 + $0x58] sm:$0xff]  ;;  %v164_v9 = vld [vmem:[%s1057_s3 + $0x68] sm:$0xff] }
   0x6   :  { %95 = vperm.xlu1 %700, %v52_v3  }
   0x7   :  { %98 = vperm.xlu0 %699, %v53_v4  }
   0xa   :  { %92 = vperm.xlu1 %700, %v51_v6  }
   0xb   :  { %239 = vperm.xlu0 %699, %v165_v7  }
   0xc   :  { %11 = vsyncpa [#allocation3], 0  ;;  %v49_v10 = vld [vmem:[%s1056_s2 + $0x50] sm:$0xff]  ;;  %v163_v11 = vld [vmem:[%s1057_s3 + $0x60] sm:$0xff]  ;;  %vm725_vm0 = vmmov 0   ;;  %v24_v51 = vlaneseq  ;;  %s727_s20 = smov [#allocation2]  }
   0xd   :  { %v48_v12 = vld [vmem:[%s1056_s2 + $0x48] sm:$0xff]  ;;  %v162_v13 = vld [vmem:[%s1057_s3 + $0x58] sm:$0xff]  ;;  %v47_v14 = vld [vmem:[%s1056_s2 + $0x40] sm:$0xff]  ;;  %621 = vmatprep.mubr.msk.f32.mxu0 %vm725_vm0, %v724_v5  ;;  %656 = vmatprep.mubr.msk.f32.mxu1 %vm725_vm0, %v724_v5  ;;  %s512_s21 = sshll.u32 %s727_s20, 4  ;;  %s513_s21 = int_to_ptr.vmem [resolvable:$true] %s512_s21 }
   0xe   :  { %89 = vperm.xlu1 %700, %v50_v8   ;;  %v161_v15 = vld [vmem:[%s1057_s3 + $0x50] sm:$0xff]  ;;  %v46_v16 = vld [vmem:[%s1056_s2 + $0x38] sm:$0xff]  ;;  %v160_v17 = vld [vmem:[%s1057_s3 + $0x48] sm:$0xff]  ;;  %v931_v52 = vand.u32 127, %v24_v51  ;;  %s701_s22 = scalar_lea.vmem %s513_s21, 128  ;;  %p706_p1 = scmp.lt.s32.totalorder %s513_s21, %s513_s21 }
   0xf   :  { %234 = vperm.xlu0 %699, %v164_v9   ;;  %v45_v18 = vld [vmem:[%s1056_s2 + $0x30] sm:$0xff]  ;;  %v159_v19 = vld [vmem:[%s1057_s3 + $0x40] sm:$0xff]  ;;  %v44_v20 = vld [vmem:[%s1056_s2 + $0x28] sm:$0xff]  ;;  %p702_p0 = scmp.ne.s32.totalorder %s513_s21, %s701_s22  ;;  %p707_p2 = scmp.lt.s32.totalorder %s701_s22, %s701_s22 }
  0x10   :  { %v158_v21 = vld [vmem:[%s1057_s3 + $0x38] sm:$0xff]  ;;  %v43_v22 = vld [vmem:[%s1056_s2 + $0x20] sm:$0xff]  ;;  %v157_v23 = vld [vmem:[%s1057_s3 + $0x30] sm:$0xff] }
  0x11   :  { %v42_v24 = vld [vmem:[%s1056_s2 + $0x18] sm:$0xff]  ;;  %v156_v25 = vld [vmem:[%s1057_s3 + $0x28] sm:$0xff]  ;;  %v41_v26 = vld [vmem:[%s1056_s2 + $0x10] sm:$0xff]  ;;  %p708_p3 = por %p707_p2, %p706_p1 }
  0x12   :  { %86 = vperm.xlu1 %700, %v49_v10   ;;  %v155_v27 = vld [vmem:[%s1057_s3 + $0x20] sm:$0xff]  ;;  %v40_v28 = vld [vmem:[%s1056_s2 + $0x8] sm:$0xff]  ;;  %v154_v29 = vld [vmem:[%s1057_s3 + $0x18] sm:$0xff] }
  0x13   :  { %229 = vperm.xlu0 %699, %v163_v11   ;;  %v39_v30 = vld [vmem:[%s1056_s2] sm:$0xff]  ;;  %v153_v31 = vld [vmem:[%s1057_s3 + $0x10] sm:$0xff]  ;;  %v152_v33 = vld [vmem:[%s1057_s3 + $0x8] sm:$0xff]  ;;  %p709_p4 = pnand %p708_p3, %p702_p0 }
  0x14   :  { %v151_v32 = vld [vmem:[%s1057_s3] sm:$0xff]  ;;  %v348_v36 = vld [vmem:[%s1058_s4 + $0x78] sm:$0xff]  ;;  %v347_v37 = vld [vmem:[%s1058_s4 + $0x70] sm:$0xff] }
  0x15   :  { %v31_v34 = vld [vmem:[%s1055_s1] sm:$0xff]  ;;  %625 = vmatpush3.msra.mxu1 %v348_v36  ;;  %v346_v38 = vld [vmem:[%s1058_s4 + $0x68] sm:$0xff]  ;;  %v344_v40 = vld [vmem:[%s1058_s4 + $0x58] sm:$0xff] }
  0x16   :  { %83 = vperm.xlu1 %700, %v48_v12   ;;  %v26_v35 = vld [vmem:[%s1054_s0] sm:$0xff]  ;;  %626 = vmatprep.subr.mxu1 %v724_v5  ;;  %v343_v41 = vld [vmem:[%s1058_s4 + $0x50] sm:$0xff]  ;;  %v342_v42 = vld [vmem:[%s1058_s4 + $0x48] sm:$0xff] }
  0x17   :  { %224 = vperm.xlu0 %699, %v162_v13   ;;  %627 = vmatpush3.msra.mxu1 %v347_v37  ;;  %v345_v39 = vld [vmem:[%s1058_s4 + $0x60] sm:$0xff]  ;;  %v340_v44 = vld [vmem:[%s1058_s4 + $0x38] sm:$0xff]  ;;  %v339_v45 = vld [vmem:[%s1058_s4 + $0x30] sm:$0xff] }
  0x18   :  { %628 = vmatprep.subr.mxu1 %v724_v5  ;;  %v341_v43 = vld [vmem:[%s1058_s4 + $0x40] sm:$0xff]  ;;  %v338_v46 = vld [vmem:[%s1058_s4 + $0x28] sm:$0xff]  ;;  %v336_v48 = vld [vmem:[%s1058_s4 + $0x18] sm:$0xff] }
  0x19   :  { %629 = vmatpush3.msra.mxu1 %v346_v38  ;;  %v337_v47 = vld [vmem:[%s1058_s4 + $0x20] sm:$0xff]  ;;  %v335_v49 = vld [vmem:[%s1058_s4 + $0x10] sm:$0xff]  ;;  %v334_v50 = vld [vmem:[%s1058_s4 + $0x8] sm:$0xff] }
  0x1a   :  { %80 = vperm.xlu1 %700, %v47_v14   ;;  %630 = vmatprep.subr.mxu1 %v724_v5 }
  0x1b   :  { %219 = vperm.xlu0 %699, %v161_v15   ;;  %631 = vmatpush3.msra.mxu1 %v345_v39 }
  0x1c   :  { %632 = vmatprep.subr.mxu1 %v724_v5 }
  0x1d   :  { %633 = vmatpush3.msra.mxu1 %v344_v40 }
  0x1e   :  { %77 = vperm.xlu1 %700, %v46_v16   ;;  %634 = vmatprep.subr.mxu1 %v724_v5 }
  0x1f   :  { %214 = vperm.xlu0 %699, %v160_v17   ;;  %635 = vmatpush3.msra.mxu1 %v343_v41 }
  0x20   :  { %636 = vmatprep.subr.mxu1 %v724_v5 }
  0x21   :  { %637 = vmatpush3.msra.mxu1 %v342_v42 }
  0x22   :  { %74 = vperm.xlu1 %700, %v45_v18   ;;  %638 = vmatprep.subr.mxu1 %v724_v5 }
  0x23   :  { %209 = vperm.xlu0 %699, %v159_v19   ;;  %639 = vmatpush3.msra.mxu1 %v341_v43 }
  0x24   :  { %640 = vmatprep.subr.mxu1 %v724_v5 }
  0x25   :  { %641 = vmatpush3.msra.mxu1 %v340_v44 }
  0x26   :  { %71 = vperm.xlu1 %700, %v44_v20   ;;  %642 = vmatprep.subr.mxu1 %v724_v5 }
  0x27   :  { %204 = vperm.xlu0 %699, %v158_v21   ;;  %643 = vmatpush3.msra.mxu1 %v339_v45 }
  0x28   :  { %644 = vmatprep.subr.mxu1 %v724_v5 }
  0x29   :  { %645 = vmatpush3.msra.mxu1 %v338_v46 }
  0x2a   :  { %68 = vperm.xlu1 %700, %v43_v22   ;;  %646 = vmatprep.subr.mxu1 %v724_v5 }
  0x2b   :  { %199 = vperm.xlu0 %699, %v157_v23   ;;  %647 = vmatpush3.msra.mxu1 %v337_v47 }
  0x2c   :  { %648 = vmatprep.subr.mxu1 %v724_v5 }
  0x2d   :  { %649 = vmatpush3.msra.mxu1 %v336_v48 }
  0x2e   :  { %65 = vperm.xlu1 %700, %v42_v24   ;;  %650 = vmatprep.subr.mxu1 %v724_v5 }
  0x2f   :  { %194 = vperm.xlu0 %699, %v156_v25   ;;  %651 = vmatpush3.msra.mxu1 %v335_v49 }
  0x30   :  { %652 = vmatprep.subr.mxu1 %v724_v5 }
  0x31   :  { %653 = vmatpush3.msra.mxu1 %v334_v50 }
  0x32   :  { %62 = vperm.xlu1 %700, %v41_v26   ;;  %654 = vmatprep.subr.mxu1 %v724_v5 }
  0x33   :  { %189 = vperm.xlu0 %699, %v155_v27  }
  0x36   :  { %59 = vperm.xlu1 %700, %v40_v28  }
  0x37   :  { %184 = vperm.xlu0 %699, %v154_v29  }
  0x3a   :  { %56 = vperm.xlu1 %700, %v39_v30  }
  0x3b   :  { %179 = vperm.xlu0 %699, %v153_v31  }
  0x3e   :  { %169 = vperm.xlu1 %700, %v151_v32  }
  0x3f   :  { %174 = vperm.xlu0 %699, %v152_v33  }
  0x42   :  { %33 = vperm.xlu1 %700, %v31_v34  }
  0x43   :  { %28 = vperm.xlu0 %699, %v26_v35  }
  0x7d   :  { %v245_v53 = vpop.permute.xlu1 %244 }
  0x7e   :  { %v102_v54 = vpop.permute.xlu0 %101 }
  0x7f   :  { %vm118_vm1 = vcmp.eq.s32.totalorder %v931_v52, %v102_v54 }
  0x80   :  { %v536_v55 = vsel %vm118_vm1, 1.0, %v724_v5 }
  0x81   :  { %v262_v56 = vmul.f32 %v536_v55, %v245_v53  ;;  %v96_v57 = vpop.permute.xlu1 %95 }
  0x82   :  { %v99_v58 = vpop.permute.xlu0 %98  ;;  %vm116_vm3 = vcmp.eq.s32.totalorder %v931_v52, %v96_v57  ;;  %v726_v57 = vmov 1.0  }
  0x83   :  { %vm117_vm2 = vcmp.eq.s32.totalorder %v931_v52, %v99_v58  ;;  %590 = vmatpush3.msra.mxu0 %v262_v56  ;;  %v534_v1 = vsel %vm116_vm3, 1.0, %v724_v5  ;;  %v333_v58 = vld [vmem:[%s1058_s4] sm:$0xff] }
  0x84   :  { %591 = vmatprep.subr.mxu0 %v724_v5  ;;  %v535_v61 = vsel %vm117_vm2, 1.0, %v724_v5  ;;  %655 = vmatpush3.msra.mxu1 %v333_v58 }
  0x85   :  { %v93_v59 = vpop.permute.xlu1 %92 }
  0x86   :  { %v240_v60 = vpop.permute.xlu0 %239  ;;  %vm115_vm4 = vcmp.eq.s32.totalorder %v931_v52, %v93_v59  ;;  %v434_v59 = vld [vmem:[%s1059_s5 + $0x78] sm:$0xff] }
  0x87   :  { %v261_v62 = vmul.f32 %v535_v61, %v240_v60  ;;  %v533_v6 = vsel %vm115_vm4, 1.0, %v724_v5  ;;  %v432_v60 = vld [vmem:[%s1059_s5 + $0x68] sm:$0xff]  ;;  %v431_v61 = vld [vmem:[%s1059_s5 + $0x60] sm:$0xff] }
  0x89   :  { %592 = vmatpush3.msra.mxu0 %v261_v62  ;;  %v90_v63 = vpop.permute.xlu1 %89  ;;  %v430_v62 = vld [vmem:[%s1059_s5 + $0x58] sm:$0xff] }
  0x8a   :  { %v235_v0 = vpop.permute.xlu0 %234  ;;  %593 = vmatprep.subr.mxu0 %v724_v5  ;;  %vm114_vm5 = vcmp.eq.s32.totalorder %v931_v52, %v90_v63  ;;  %v429_v63 = vld [vmem:[%s1059_s5 + $0x50] sm:$0xff] }
  0x8b   :  { %v260_v2 = vmul.f32 %v534_v1, %v235_v0  ;;  %v532_v10 = vsel %vm114_vm5, 1.0, %v724_v5  ;;  %v428_v0 = vld [vmem:[%s1059_s5 + $0x48] sm:$0xff]  ;;  %v427_v1 = vld [vmem:[%s1059_s5 + $0x40] sm:$0xff] }
  0x8d   :  { %594 = vmatpush3.msra.mxu0 %v260_v2  ;;  %v87_v3 = vpop.permute.xlu1 %86  ;;  %v426_v2 = vld [vmem:[%s1059_s5 + $0x38] sm:$0xff] }
  0x8e   :  { %v230_v4 = vpop.permute.xlu0 %229  ;;  %595 = vmatprep.subr.mxu0 %v724_v5  ;;  %vm113_vm6 = vcmp.eq.s32.totalorder %v931_v52, %v87_v3  ;;  %v425_v3 = vld [vmem:[%s1059_s5 + $0x30] sm:$0xff] }
  0x8f   :  { %v259_v7 = vmul.f32 %v533_v6, %v230_v4  ;;  %v531_v14 = vsel %vm113_vm6, 1.0, %v724_v5  ;;  %v424_v4 = vld [vmem:[%s1059_s5 + $0x28] sm:$0xff]  ;;  %v423_v6 = vld [vmem:[%s1059_s5 + $0x20] sm:$0xff] }
  0x91   :  { %596 = vmatpush3.msra.mxu0 %v259_v7  ;;  %v84_v8 = vpop.permute.xlu1 %83  ;;  %v422_v7 = vld [vmem:[%s1059_s5 + $0x18] sm:$0xff] }
  0x92   :  { %v225_v9 = vpop.permute.xlu0 %224  ;;  %597 = vmatprep.subr.mxu0 %v724_v5  ;;  %vm112_vm7 = vcmp.eq.s32.totalorder %v931_v52, %v84_v8  ;;  %v421_v8 = vld [vmem:[%s1059_s5 + $0x10] sm:$0xff] }
  0x93   :  { %v258_v11 = vmul.f32 %v532_v10, %v225_v9  ;;  %v530_v18 = vsel %vm112_vm7, 1.0, %v724_v5  ;;  %v420_v9 = vld [vmem:[%s1059_s5 + $0x8] sm:$0xff] }
  0x95   :  { %598 = vmatpush3.msra.mxu0 %v258_v11  ;;  %v81_v12 = vpop.permute.xlu1 %80 }
  0x96   :  { %v220_v13 = vpop.permute.xlu0 %219  ;;  %599 = vmatprep.subr.mxu0 %v724_v5  ;;  %vm111_vm8 = vcmp.eq.s32.totalorder %v931_v52, %v81_v12  ;;  %v419_v12 = vld [vmem:[%s1059_s5] sm:$0xff] }
  0x97   :  { %v257_v15 = vmul.f32 %v531_v14, %v220_v13  ;;  %v529_v22 = vsel %vm111_vm8, 1.0, %v724_v5 }
  0x99   :  { %600 = vmatpush3.msra.mxu0 %v257_v15  ;;  %v78_v16 = vpop.permute.xlu1 %77 }
  0x9a   :  { %v215_v17 = vpop.permute.xlu0 %214  ;;  %601 = vmatprep.subr.mxu0 %v724_v5  ;;  %vm110_vm9 = vcmp.eq.s32.totalorder %v931_v52, %v78_v16 }
  0x9b   :  { %v256_v19 = vmul.f32 %v530_v18, %v215_v17  ;;  %v528_v26 = vsel %vm110_vm9, 1.0, %v724_v5 }
  0x9d   :  { %602 = vmatpush3.msra.mxu0 %v256_v19  ;;  %v75_v20 = vpop.permute.xlu1 %74 }
  0x9e   :  { %v210_v21 = vpop.permute.xlu0 %209  ;;  %603 = vmatprep.subr.mxu0 %v724_v5  ;;  %vm109_vm10 = vcmp.eq.s32.totalorder %v931_v52, %v75_v20 }
  0x9f   :  { %v255_v23 = vmul.f32 %v529_v22, %v210_v21  ;;  %v527_v30 = vsel %vm109_vm10, 1.0, %v724_v5 }
  0xa1   :  { %604 = vmatpush3.msra.mxu0 %v255_v23  ;;  %v72_v24 = vpop.permute.xlu1 %71 }
  0xa2   :  { %v205_v25 = vpop.permute.xlu0 %204  ;;  %605 = vmatprep.subr.mxu0 %v724_v5  ;;  %vm108_vm11 = vcmp.eq.s32.totalorder %v931_v52, %v72_v24 }
  0xa3   :  { %v254_v27 = vmul.f32 %v528_v26, %v205_v25  ;;  %v526_v34 = vsel %vm108_vm11, 1.0, %v724_v5 }
  0xa5   :  { %606 = vmatpush3.msra.mxu0 %v254_v27  ;;  %v69_v28 = vpop.permute.xlu1 %68 }
  0xa6   :  { %v200_v29 = vpop.permute.xlu0 %199  ;;  %607 = vmatprep.subr.mxu0 %v724_v5  ;;  %vm107_vm12 = vcmp.eq.s32.totalorder %v931_v52, %v69_v28 }
  0xa7   :  { %v253_v31 = vmul.f32 %v527_v30, %v200_v29  ;;  %v525_v38 = vsel %vm107_vm12, 1.0, %v724_v5 }
  0xa9   :  { %608 = vmatpush3.msra.mxu0 %v253_v31  ;;  %v66_v32 = vpop.permute.xlu1 %65 }
  0xaa   :  { %v195_v33 = vpop.permute.xlu0 %194  ;;  %609 = vmatprep.subr.mxu0 %v724_v5  ;;  %vm106_vm13 = vcmp.eq.s32.totalorder %v931_v52, %v66_v32 }
  0xab   :  { %v252_v35 = vmul.f32 %v526_v34, %v195_v33  ;;  %v524_v42 = vsel %vm106_vm13, 1.0, %v724_v5 }
  0xad   :  { %610 = vmatpush3.msra.mxu0 %v252_v35  ;;  %v63_v36 = vpop.permute.xlu1 %62 }
  0xae   :  { %v190_v37 = vpop.permute.xlu0 %189  ;;  %611 = vmatprep.subr.mxu0 %v724_v5  ;;  %vm105_vm14 = vcmp.eq.s32.totalorder %v931_v52, %v63_v36 }
  0xaf   :  { %v251_v39 = vmul.f32 %v525_v38, %v190_v37  ;;  %v523_v46 = vsel %vm105_vm14, 1.0, %v724_v5 }
  0xb1   :  { %612 = vmatpush3.msra.mxu0 %v251_v39  ;;  %v60_v40 = vpop.permute.xlu1 %59 }
  0xb2   :  { %v185_v41 = vpop.permute.xlu0 %184  ;;  %613 = vmatprep.subr.mxu0 %v724_v5  ;;  %vm104_vm15 = vcmp.eq.s32.totalorder %v931_v52, %v60_v40 }
  0xb3   :  { %v250_v43 = vmul.f32 %v524_v42, %v185_v41  ;;  %v522_v50 = vsel %vm104_vm15, 1.0, %v724_v5 }
  0xb5   :  { %614 = vmatpush3.msra.mxu0 %v250_v43  ;;  %v57_v44 = vpop.permute.xlu1 %56 }
  0xb6   :  { %v180_v45 = vpop.permute.xlu0 %179  ;;  %615 = vmatprep.subr.mxu0 %v724_v5  ;;  %vm103_vm1 = vcmp.eq.s32.totalorder %v931_v52, %v57_v44 }
  0xb7   :  { %v249_v47 = vmul.f32 %v523_v46, %v180_v45  ;;  %v521_v53 = vsel %vm103_vm1, 1.0, %v724_v5 }
  0xb9   :  { %616 = vmatpush3.msra.mxu0 %v249_v47  ;;  %v170_v48 = vpop.permute.xlu1 %169 }
  0xba   :  { %v175_v49 = vpop.permute.xlu0 %174  ;;  %617 = vmatprep.subr.mxu0 %v724_v5  ;;  %v247_v54 = vmul.f32 %v521_v53, %v170_v48 }
  0xbb   :  { %v248_v51 = vmul.f32 %v522_v50, %v175_v49 }
  0xbd   :  { %618 = vmatpush3.msra.mxu0 %v248_v51  ;;  %v34_v55 = vpop.permute.xlu1 %33 }
  0xbe   :  { %v29_v56 = vpop.permute.xlu0 %28  ;;  %619 = vmatprep.subr.mxu0 %v724_v5  ;;  %vm35_vm2 = vcmp.lt.s32.totalorder %v931_v52, %v34_v55 }
  0xbf   :  { %vm30_vm3 = vcmp.ge.s32.totalorder %v931_v52, %v29_v56  ;;  %620 = vmatpush3.msra.mxu0 %v247_v54  ;;  %v433_v52 = vld [vmem:[%s1059_s5 + $0x70] sm:$0xff] }
  0xc0   :  { %vm36_vm4 = vmand %vm30_vm3, %vm35_vm2  ;;  %659 = vmatprep.subr.mxu0 %v724_v5 }
  0xc1   :  { %622 = vmatmul.mubr.msk.f32.vlgmr.msra.gmra.mxu0 %vm36_vm4, %v726_v57 }
  0xc2   :  { %691 = vmatprep.mubr.msk.f32.mxu0 %vm725_vm0, %v724_v5  ;;  %660 = vmatpush3.msra.mxu0 %v434_v59 }
  0xc3   :  { %661 = vmatprep.subr.mxu0 %v724_v5 }
  0xc4   :  { %662 = vmatpush3.msra.mxu0 %v433_v52 }
  0xc5   :  { %663 = vmatprep.subr.mxu0 %v724_v5 }
  0xc6   :  { %664 = vmatpush3.msra.mxu0 %v432_v60 }
  0xc7   :  { %665 = vmatprep.subr.mxu0 %v724_v5 }
  0xc8   :  { %666 = vmatpush3.msra.mxu0 %v431_v61 }
  0xc9   :  { %667 = vmatprep.subr.mxu0 %v724_v5 }
  0xca   :  { %668 = vmatpush3.msra.mxu0 %v430_v62 }
  0xcb   :  { %669 = vmatprep.subr.mxu0 %v724_v5 }
  0xcc   :  { %670 = vmatpush3.msra.mxu0 %v429_v63 }
  0xcd   :  { %671 = vmatprep.subr.mxu0 %v724_v5 }
  0xce   :  { %672 = vmatpush3.msra.mxu0 %v428_v0 }
  0xcf   :  { %673 = vmatprep.subr.mxu0 %v724_v5 }
  0xd0   :  { %674 = vmatpush3.msra.mxu0 %v427_v1 }
  0xd1   :  { %675 = vmatprep.subr.mxu0 %v724_v5 }
  0xd2   :  { %676 = vmatpush3.msra.mxu0 %v426_v2 }
  0xd3   :  { %677 = vmatprep.subr.mxu0 %v724_v5 }
  0xd4   :  { %678 = vmatpush3.msra.mxu0 %v425_v3 }
  0xd5   :  { %679 = vmatprep.subr.mxu0 %v724_v5 }
  0xd6   :  { %680 = vmatpush3.msra.mxu0 %v424_v4 }
  0xd7   :  { %681 = vmatprep.subr.mxu0 %v724_v5 }
  0xd8   :  { %682 = vmatpush3.msra.mxu0 %v423_v6 }
  0xd9   :  { %683 = vmatprep.subr.mxu0 %v724_v5 }
  0xda   :  { %684 = vmatpush3.msra.mxu0 %v422_v7 }
  0xdb   :  { %685 = vmatprep.subr.mxu0 %v724_v5 }
  0xdc   :  { %686 = vmatpush3.msra.mxu0 %v421_v8 }
  0xdd   :  { %687 = vmatprep.subr.mxu0 %v724_v5 }
  0xde   :  { %688 = vmatpush3.msra.mxu0 %v420_v9 }
  0xdf   :  { %689 = vmatprep.subr.mxu0 %v724_v5 }
  0xe0   :  { %690 = vmatpush3.msra.mxu0 %v419_v12 }
 0x181   :  { %v329_v10 = vpop.f32.mrf.mxu0 }
 0x182   :  { %657 = vmatmul.mubr.f32.vlgmr.msra.gmra.mxu1 %v329_v10 }
 0x183   :  { %v623_v11 = vpop.f32.mrf.mxu0 }
 0x242   :  { %v415_v13 = vpop.f32.mrf.mxu1 }
 0x243   :  { %692 = vmatmul.mubr.f32.vlgmr.msra.gmra.mxu0 %v415_v13 }
 0x244   :  { %v658_v14 = vpop.f32.mrf.mxu1 }
 0x303   :  { %v501_v15 = vpop.f32.mrf.mxu0 }
 0x304   :  { %505 = vst [vmem:[#allocation2] sm:$0xff] %v501_v15 }
 0x305   :  { %v693_v16 = vpop.f32.mrf.mxu0 }
 0x306   :  { %712 = shalt.err (!%p709_p4)
}
 0x307   :  { %515 = dma.vmem_to_hbm [thread:$0]  %s513_s21, 128, %s1060_s6, [#allocation3]  }
 0x308   :  { %721 = dma.done.wait [#allocation3], 128  }
 0x309   :  { %722 = vsyncadd [#allocation3], 4294967168 }
 0x30a   :  { %519 = vsyncpa [#allocation3], 1 }

</bundles_post_ra>
